<compile_context>
chip_gen: v7x
topology: tpu7x:2x2x1
jax: 0.10.0
libtpu: 0.0.40
codegen_flags: <defaults>
</compile_context>

<pallas_src>
import functools

import jax
import jax.numpy as jnp
import numpy as np
from jax.experimental import pallas as pl
from jax.experimental.pallas import tpu as pltpu

LAYERS = [2, 20, 20, 20, 20, 20, 20, 20, 20, 1]   # np.array([2,20,...,20,1])
N_LAYERS = len(LAYERS) - 1                        # 9 linear layers
N_HID = N_LAYERS - 2                              # 7 stacked hidden layers (1..7)
F_PAD = 32                                        # padded feature width (sublanes)
                                                  # 32 = lcm(8 f32, 16 bf16 sublanes)


def _pinn_kernel(x_ref, w0_ref, b0_ref, wh_ref, bh_ref, wl_ref, bl_ref, o_ref,
                 *, act_dtype):
    """One batch tile; features on sublanes, batch on lanes.

    x_ref : (2, BN)       f32   raw (x, t) columns — 8 B/row of HBM traffic
    w0_ref: (F_PAD, 2)    f32   layer-0 weights (out, in), normalization folded
    b0_ref: (F_PAD, 1)    f32   layer-0 bias, normalization folded
    wh_ref: (7, F_PAD, F_PAD)   hidden weights (out, in); f32 or bf16
    bh_ref: (7, F_PAD, 1) f32   hidden biases
    wl_ref: (F_PAD, 1)    f32   final-layer weight column
    bl_ref: (1, 1)        f32   final-layer bias
    o_ref : (1, BN)       f32   prediction row — lane-dense writeback
    """
    # Layer 0: normalization already folded into (w0, b0).  The x rows are
    # stride-0 sublane broadcasts (cheap); the tiny w0 columns are lane-
    # broadcast once per tile.  Pure VPU + EUP work, no tiny-K matmul.
    x0 = x_ref[0:1, :]                                   # (1, BN)
    x1 = x_ref[1:2, :]                                   # (1, BN)
    z = w0_ref[:, 0:1] * x0 + w0_ref[:, 1:2] * x1 + b0_ref[...]
    a = jnp.tanh(z.astype(act_dtype))                    # (F_PAD, BN)

    # Hidden layers 1..7: MXU matmul (f32 accumulate) + bias + tanh.  Padded
    # feature rows/cols have zero weights and zero bias -> tanh(0) = 0, so the
    # padding never leaks into real outputs.
    w_dtype = wh_ref.dtype
    for i in range(N_HID):
        z = jnp.dot(wh_ref[i], a.astype(w_dtype),
                    preferred_element_type=jnp.float32) + bh_ref[i]
        a = jnp.tanh(z.astype(act_dtype))

    # Final 20 -> 1 linear as a sublane (XLU) reduction against the single real
    # output column; padded sublanes of wl are zero.  Result is a lane-dense
    # (1, BN) row -> unmasked stores.
    out = jnp.sum(a.astype(jnp.float32) * wl_ref[...], axis=0, keepdims=True)
    o_ref[...] = out + bl_ref[...]


def _ceil_to(v, m):
    return ((v + m - 1) // m) * m


def _pick_block(n, block_n):
    """Largest 128-multiple tile <= block_n; prefer an even grid-step count
    (feeds both v7x TensorCores) without shrinking the tile more than 2x.
    Single-tile grids are left alone (v5e/v6e have one TC; no reason to split)."""
    cap = max(128, min(block_n, _ceil_to(n, 128)))
    for bn in range(cap, max(128, cap // 2) - 1, -128):
        if (-(-n // bn)) % 2 == 0:
            return bn
    return cap


@functools.partial(jax.jit, static_argnames=("block_n", "act_dtype"))
def pinn_forward(x, w0, b0, wh, bh, wl, bl, *, block_n=1024,
                 act_dtype=jnp.float32):
    """x: (N, 2) float32 -> (N, 1) float32 (packed params from pack_params).

    act_dtype=jnp.bfloat16 runs tanh/activation carries in bf16 (v6e/v7x
    recipe); keep f32 on v5e.  Weight dtype is chosen at pack time.
    """
    n = x.shape[0]
    bn = _pick_block(n, block_n)
    n_pad = _ceil_to(n, bn)

    # Present x as (2, N): batch on lanes.  Padded columns are zeros; their
    # (finite) outputs are sliced off below.
    xt = jnp.zeros((2, n_pad), jnp.float32).at[:, :n].set(x.T.astype(jnp.float32))

    grid = (n_pad // bn,)
    out = pl.pallas_call(
        functools.partial(_pinn_kernel, act_dtype=act_dtype),
        out_shape=jax.ShapeDtypeStruct((1, n_pad), jnp.float32),
        grid_spec=pltpu.PrefetchScalarGridSpec(
            num_scalar_prefetch=0,
            grid=grid,
            in_specs=[
                pl.BlockSpec((2, bn), lambda i: (0, i)),                   # x cols
                # Grid-invariant params (index maps constant -> fetched once,
                # resident in VMEM; total < 32 KiB so double-buffering them is
                # negligible and no Buffered(1) override is needed).
                pl.BlockSpec((F_PAD, 2), lambda i: (0, 0)),                # w0
                pl.BlockSpec((F_PAD, 1), lambda i: (0, 0)),                # b0
                pl.BlockSpec((N_HID, F_PAD, F_PAD), lambda i: (0, 0, 0)),  # W hidden
                pl.BlockSpec((N_HID, F_PAD, 1), lambda i: (0, 0, 0)),      # b hidden
                pl.BlockSpec((F_PAD, 1), lambda i: (0, 0)),                # w_last
                pl.BlockSpec((1, 1), lambda i: (0, 0)),                    # b_last
            ],
            out_specs=pl.BlockSpec((1, bn), lambda i: (0, i)),             # lane-dense
        ),
        compiler_params=pltpu.CompilerParams(
            dimension_semantics=("parallel",)),
    )(xt, w0, b0, wh, bh, wl, bl)

    return out.reshape(n_pad, 1)[:n]


def init_params(key):
    """Xavier-normal (gain=3.0) weights in (in, out) layout and zero biases."""
    gain = 3.0
    keys = jax.random.split(key, N_LAYERS)
    params = []
    for i in range(N_LAYERS):
        fan_in, fan_out = LAYERS[i], LAYERS[i + 1]
        std = gain * np.sqrt(2.0 / (fan_in + fan_out))
        w = std * jax.random.normal(keys[i], (fan_in, fan_out), jnp.float32)
        b = jnp.zeros((fan_out,), jnp.float32)
        params.append((w, b))
    return params


def pack_params(params, lb, ub, param_dtype=jnp.float32):
    """Fold input normalization into layer 0 and pack to the transposed
    feature-on-sublane layout (done once, off the hot path).

    param_dtype=jnp.bfloat16 -> native bf16 MXU matmuls (recommended on all
    generations, especially v5e whose MXU is bf16-native).  Biases, layer 0
    and the final column stay f32 (VPU/XLU work, negligible size).
    """
    ws = [np.asarray(w, np.float32) for w, _ in params]   # (in, out)
    bs = [np.asarray(b, np.float32) for _, b in params]
    lb = np.asarray(lb, np.float32)
    ub = np.asarray(ub, np.float32)
    s = 1.0 / (ub - lb)               # NOTE: inf/NaN if ub == lb (same as reference)

    # layer 0 with normalization folded:  x @ (diag(s) W0) + (b0 - (lb*s) @ W0)
    w0 = ws[0] * s[:, None]                   # (2, 20), (in, out)
    b0 = bs[0] - (lb * s) @ ws[0]             # (20,)
    w0p = np.zeros((F_PAD, 2), np.float32); w0p[:LAYERS[1], :] = w0.T   # (out, in)
    b0p = np.zeros((F_PAD, 1), np.float32); b0p[:LAYERS[1], 0] = b0

    wh = np.zeros((N_HID, F_PAD, F_PAD), np.float32)      # (layer, out, in)
    bh = np.zeros((N_HID, F_PAD, 1), np.float32)
    for i in range(N_HID):                                # layers 1..7
        fi, fo = LAYERS[i + 1], LAYERS[i + 2]
        wh[i, :fo, :fi] = ws[i + 1].T
        bh[i, :fo, 0] = bs[i + 1]

    wlp = np.zeros((F_PAD, 1), np.float32); wlp[:LAYERS[-2], 0] = ws[-1][:, 0]
    blp = np.full((1, 1), float(bs[-1][0]), np.float32)

    return (jnp.asarray(w0p), jnp.asarray(b0p),
            jnp.asarray(wh, param_dtype), jnp.asarray(bh),
            jnp.asarray(wlp), jnp.asarray(blp))


def reference_forward(x, lb, ub, params):
    """Plain-JAX reference mirroring the PyTorch module's forward."""
    a = (x - lb) / (ub - lb)
    for w, b in params[:-1]:
        a = jnp.tanh(a @ w + b)
    w, b = params[-1]
    return a @ w + b


if __name__ == "__main__":
    key = jax.random.PRNGKey(0)
    k_param, k_jitter = jax.random.split(key)

    # Small synthetic (x, t) collocation grid, flattened Fortran-style like the
    # original script's xt_test (nx * nt rows, 2 columns).
    nx, nt = 24, 24
    length, t_max = 5000.0, 1.0
    xs = np.linspace(0.0, length, nx, dtype=np.float32)
    ts = np.linspace(0.0, t_max, nt, dtype=np.float32)
    xx, tt = np.meshgrid(xs, ts, indexing="ij")
    xt_np = np.stack([xx.flatten(order="F"), tt.flatten(order="F")], axis=1)
    xt_test = (jnp.asarray(xt_np, jnp.float32)
               + 1e-3 * jax.random.normal(k_jitter, (nx * nt, 2), jnp.float32))

    lb = xt_test[0]      # lower bound, shape (2,)
    ub = xt_test[-1]     # upper bound, shape (2,)

    params = init_params(k_param)
    y_ref = reference_forward(xt_test, lb, ub, params)

    # --- f32 path (v5e-friendly; exercises multi-tile grid + batch padding) ---
    packed_f32 = pack_params(params, lb, ub, param_dtype=jnp.float32)
    y_f32 = pinn_forward(xt_test, *packed_f32, block_n=256,
                         act_dtype=jnp.float32)
    y_f32 = jax.block_until_ready(y_f32)
    assert y_f32.shape == (xt_test.shape[0], 1)
    np.testing.assert_allclose(np.asarray(y_f32), np.asarray(y_ref),
                               rtol=1e-4, atol=1e-4)

    # --- bf16 path (v6e/v7x recipe: bf16 weights + bf16 tanh/activations) ---
    packed_bf16 = pack_params(params, lb, ub, param_dtype=jnp.bfloat16)
    y_bf16 = pinn_forward(xt_test, *packed_bf16, act_dtype=jnp.bfloat16)
    y_bf16 = jax.block_until_ready(y_bf16)
    rel = (np.linalg.norm(np.asarray(y_bf16, np.float32) - np.asarray(y_ref))
           / (np.linalg.norm(np.asarray(y_ref)) + 1e-12))
    # bf16 through 8 tanh layers trades precision for EUP/MXU throughput; a
    # loose sanity bound still catches layout/packing bugs (which give O(1) err).
    assert np.isfinite(rel) and rel < 0.2, f"bf16 relative error too large: {rel}"

    # TODO(synk): loss_PDE / autograd-based physics residual and the FEM_wave
    # ground-truth solver are training/eval-time constructs (need jacobians),
    # not part of the forward kernel.
    print("KERNEL_OK")
</pallas_src>

<mosaic_0001>
module attributes {stable_mosaic.version = 11 : i64} {
  func.func @_pinn_kernel(%arg0: i32, %arg1: memref<2x256xf32, #tpu.memory_space<vmem>>, %arg2: memref<32x2xf32, #tpu.memory_space<vmem>>, %arg3: memref<32x1xf32, #tpu.memory_space<vmem>>, %arg4: memref<7x32x32xf32, #tpu.memory_space<vmem>>, %arg5: memref<7x32x1xf32, #tpu.memory_space<vmem>>, %arg6: memref<32x1xf32, #tpu.memory_space<vmem>>, %arg7: memref<1x1xf32, #tpu.memory_space<vmem>>, %arg8: memref<1x256xf32, #tpu.memory_space<vmem>>) attributes {dimension_semantics = [#tpu.dimension_semantics<parallel>], iteration_bounds = array<i64: 3>, scalar_prefetch = 0 : i64, scratch_operands = 0 : i64, tpu.core_type = #tpu.core_type<tc>, window_params = [{transform_indices = @transform_0, window_bounds = array<i64: 2, 256>}, {pipeline_mode = #tpu.pipeline_mode<synchronous>, transform_indices = @transform_1, window_bounds = array<i64: 32, 2>}, {pipeline_mode = #tpu.pipeline_mode<synchronous>, transform_indices = @transform_2, window_bounds = array<i64: 32, 1>}, {pipeline_mode = #tpu.pipeline_mode<synchronous>, transform_indices = @transform_3, window_bounds = array<i64: 7, 32, 32>}, {pipeline_mode = #tpu.pipeline_mode<synchronous>, transform_indices = @transform_4, window_bounds = array<i64: 7, 32, 1>}, {pipeline_mode = #tpu.pipeline_mode<synchronous>, transform_indices = @transform_5, window_bounds = array<i64: 32, 1>}, {pipeline_mode = #tpu.pipeline_mode<synchronous>, transform_indices = @transform_6, window_bounds = array<i64: 1, 1>}, {transform_indices = @transform_7, window_bounds = array<i64: 1, 256>}]} {
    %c0 = arith.constant 0 : index
    %c0_0 = arith.constant 0 : index
    %0 = vector.load %arg1[%c0, %c0_0] : memref<2x256xf32, #tpu.memory_space<vmem>>, vector<1x256xf32>
    %c1 = arith.constant 1 : index
    %c0_1 = arith.constant 0 : index
    %1 = vector.load %arg1[%c1, %c0_1] : memref<2x256xf32, #tpu.memory_space<vmem>>, vector<1x256xf32>
    %c0_2 = arith.constant 0 : index
    %c0_3 = arith.constant 0 : index
    %2 = vector.load %arg2[%c0_2, %c0_3] : memref<32x2xf32, #tpu.memory_space<vmem>>, vector<32x1xf32>
    %3 = vector.broadcast %2 : vector<32x1xf32> to vector<32x256xf32>
    %4 = vector.broadcast %0 : vector<1x256xf32> to vector<32x256xf32>
    %5 = arith.mulf %3, %4 : vector<32x256xf32>
    %c0_4 = arith.constant 0 : index
    %c1_5 = arith.constant 1 : index
    %6 = vector.load %arg2[%c0_4, %c1_5] : memref<32x2xf32, #tpu.memory_space<vmem>>, vector<32x1xf32>
    %7 = vector.broadcast %6 : vector<32x1xf32> to vector<32x256xf32>
    %8 = vector.broadcast %1 : vector<1x256xf32> to vector<32x256xf32>
    %9 = arith.mulf %7, %8 : vector<32x256xf32>
    %10 = arith.addf %5, %9 : vector<32x256xf32>
    %c0_6 = arith.constant 0 : index
    %c0_7 = arith.constant 0 : index
    %11 = vector.load %arg3[%c0_6, %c0_7] : memref<32x1xf32, #tpu.memory_space<vmem>>, vector<32x1xf32>
    %12 = vector.broadcast %11 : vector<32x1xf32> to vector<32x256xf32>
    %13 = arith.addf %10, %12 : vector<32x256xf32>
    %14 = math.tanh %13 : vector<32x256xf32>
    %c0_8 = arith.constant 0 : index
    %c0_9 = arith.constant 0 : index
    %c0_10 = arith.constant 0 : index
    %15 = vector.load %arg4[%c0_8, %c0_9, %c0_10] : memref<7x32x32xf32, #tpu.memory_space<vmem>>, vector<1x32x32xf32>
    %16 = vector.shape_cast %15 : vector<1x32x32xf32> to vector<32x32xf32>
    %cst = arith.constant dense<0.000000e+00> : vector<32x256xf32>
    %17 = tpu.matmul %16, %14, %cst {dimension_numbers = #tpu.dot_dimension_numbers<[1], [0], [0], [1], [0, 0, 1, 1], [], []>} : vector<32x32xf32>, vector<32x256xf32>, vector<32x256xf32> -> vector<32x256xf32>
    %c0_11 = arith.constant 0 : index
    %c0_12 = arith.constant 0 : index
    %c0_13 = arith.constant 0 : index
    %18 = vector.load %arg5[%c0_11, %c0_12, %c0_13] : memref<7x32x1xf32, #tpu.memory_space<vmem>>, vector<1x32x1xf32>
    %19 = vector.shape_cast %18 : vector<1x32x1xf32> to vector<32x1xf32>
    %20 = vector.broadcast %19 : vector<32x1xf32> to vector<32x256xf32>
    %21 = arith.addf %17, %20 : vector<32x256xf32>
    %22 = math.tanh %21 : vector<32x256xf32>
    %c1_14 = arith.constant 1 : index
    %c0_15 = arith.constant 0 : index
    %c0_16 = arith.constant 0 : index
    %23 = vector.load %arg4[%c1_14, %c0_15, %c0_16] : memref<7x32x32xf32, #tpu.memory_space<vmem>>, vector<1x32x32xf32>
    %24 = vector.shape_cast %23 : vector<1x32x32xf32> to vector<32x32xf32>
    %cst_17 = arith.constant dense<0.000000e+00> : vector<32x256xf32>
    %25 = tpu.matmul %24, %22, %cst_17 {dimension_numbers = #tpu.dot_dimension_numbers<[1], [0], [0], [1], [0, 0, 1, 1], [], []>} : vector<32x32xf32>, vector<32x256xf32>, vector<32x256xf32> -> vector<32x256xf32>
    %c1_18 = arith.constant 1 : index
    %c0_19 = arith.constant 0 : index
    %c0_20 = arith.constant 0 : index
    %26 = vector.load %arg5[%c1_18, %c0_19, %c0_20] : memref<7x32x1xf32, #tpu.memory_space<vmem>>, vector<1x32x1xf32>
    %27 = vector.shape_cast %26 : vector<1x32x1xf32> to vector<32x1xf32>
    %28 = vector.broadcast %27 : vector<32x1xf32> to vector<32x256xf32>
    %29 = arith.addf %25, %28 : vector<32x256xf32>
    %30 = math.tanh %29 : vector<32x256xf32>
    %c2 = arith.constant 2 : index
    %c0_21 = arith.constant 0 : index
    %c0_22 = arith.constant 0 : index
    %31 = vector.load %arg4[%c2, %c0_21, %c0_22] : memref<7x32x32xf32, #tpu.memory_space<vmem>>, vector<1x32x32xf32>
    %32 = vector.shape_cast %31 : vector<1x32x32xf32> to vector<32x32xf32>
    %cst_23 = arith.constant dense<0.000000e+00> : vector<32x256xf32>
    %33 = tpu.matmul %32, %30, %cst_23 {dimension_numbers = #tpu.dot_dimension_numbers<[1], [0], [0], [1], [0, 0, 1, 1], [], []>} : vector<32x32xf32>, vector<32x256xf32>, vector<32x256xf32> -> vector<32x256xf32>
    %c2_24 = arith.constant 2 : index
    %c0_25 = arith.constant 0 : index
    %c0_26 = arith.constant 0 : index
    %34 = vector.load %arg5[%c2_24, %c0_25, %c0_26] : memref<7x32x1xf32, #tpu.memory_space<vmem>>, vector<1x32x1xf32>
    %35 = vector.shape_cast %34 : vector<1x32x1xf32> to vector<32x1xf32>
    %36 = vector.broadcast %35 : vector<32x1xf32> to vector<32x256xf32>
    %37 = arith.addf %33, %36 : vector<32x256xf32>
    %38 = math.tanh %37 : vector<32x256xf32>
    %c3 = arith.constant 3 : index
    %c0_27 = arith.constant 0 : index
    %c0_28 = arith.constant 0 : index
    %39 = vector.load %arg4[%c3, %c0_27, %c0_28] : memref<7x32x32xf32, #tpu.memory_space<vmem>>, vector<1x32x32xf32>
    %40 = vector.shape_cast %39 : vector<1x32x32xf32> to vector<32x32xf32>
    %cst_29 = arith.constant dense<0.000000e+00> : vector<32x256xf32>
    %41 = tpu.matmul %40, %38, %cst_29 {dimension_numbers = #tpu.dot_dimension_numbers<[1], [0], [0], [1], [0, 0, 1, 1], [], []>} : vector<32x32xf32>, vector<32x256xf32>, vector<32x256xf32> -> vector<32x256xf32>
    %c3_30 = arith.constant 3 : index
    %c0_31 = arith.constant 0 : index
    %c0_32 = arith.constant 0 : index
    %42 = vector.load %arg5[%c3_30, %c0_31, %c0_32] : memref<7x32x1xf32, #tpu.memory_space<vmem>>, vector<1x32x1xf32>
    %43 = vector.shape_cast %42 : vector<1x32x1xf32> to vector<32x1xf32>
    %44 = vector.broadcast %43 : vector<32x1xf32> to vector<32x256xf32>
    %45 = arith.addf %41, %44 : vector<32x256xf32>
    %46 = math.tanh %45 : vector<32x256xf32>
    %c4 = arith.constant 4 : index
    %c0_33 = arith.constant 0 : index
    %c0_34 = arith.constant 0 : index
    %47 = vector.load %arg4[%c4, %c0_33, %c0_34] : memref<7x32x32xf32, #tpu.memory_space<vmem>>, vector<1x32x32xf32>
    %48 = vector.shape_cast %47 : vector<1x32x32xf32> to vector<32x32xf32>
    %cst_35 = arith.constant dense<0.000000e+00> : vector<32x256xf32>
    %49 = tpu.matmul %48, %46, %cst_35 {dimension_numbers = #tpu.dot_dimension_numbers<[1], [0], [0], [1], [0, 0, 1, 1], [], []>} : vector<32x32xf32>, vector<32x256xf32>, vector<32x256xf32> -> vector<32x256xf32>
    %c4_36 = arith.constant 4 : index
    %c0_37 = arith.constant 0 : index
    %c0_38 = arith.constant 0 : index
    %50 = vector.load %arg5[%c4_36, %c0_37, %c0_38] : memref<7x32x1xf32, #tpu.memory_space<vmem>>, vector<1x32x1xf32>
    %51 = vector.shape_cast %50 : vector<1x32x1xf32> to vector<32x1xf32>
    %52 = vector.broadcast %51 : vector<32x1xf32> to vector<32x256xf32>
    %53 = arith.addf %49, %52 : vector<32x256xf32>
    %54 = math.tanh %53 : vector<32x256xf32>
    %c5 = arith.constant 5 : index
    %c0_39 = arith.constant 0 : index
    %c0_40 = arith.constant 0 : index
    %55 = vector.load %arg4[%c5, %c0_39, %c0_40] : memref<7x32x32xf32, #tpu.memory_space<vmem>>, vector<1x32x32xf32>
    %56 = vector.shape_cast %55 : vector<1x32x32xf32> to vector<32x32xf32>
    %cst_41 = arith.constant dense<0.000000e+00> : vector<32x256xf32>
    %57 = tpu.matmul %56, %54, %cst_41 {dimension_numbers = #tpu.dot_dimension_numbers<[1], [0], [0], [1], [0, 0, 1, 1], [], []>} : vector<32x32xf32>, vector<32x256xf32>, vector<32x256xf32> -> vector<32x256xf32>
    %c5_42 = arith.constant 5 : index
    %c0_43 = arith.constant 0 : index
    %c0_44 = arith.constant 0 : index
    %58 = vector.load %arg5[%c5_42, %c0_43, %c0_44] : memref<7x32x1xf32, #tpu.memory_space<vmem>>, vector<1x32x1xf32>
    %59 = vector.shape_cast %58 : vector<1x32x1xf32> to vector<32x1xf32>
    %60 = vector.broadcast %59 : vector<32x1xf32> to vector<32x256xf32>
    %61 = arith.addf %57, %60 : vector<32x256xf32>
    %62 = math.tanh %61 : vector<32x256xf32>
    %c6 = arith.constant 6 : index
    %c0_45 = arith.constant 0 : index
    %c0_46 = arith.constant 0 : index
    %63 = vector.load %arg4[%c6, %c0_45, %c0_46] : memref<7x32x32xf32, #tpu.memory_space<vmem>>, vector<1x32x32xf32>
    %64 = vector.shape_cast %63 : vector<1x32x32xf32> to vector<32x32xf32>
    %cst_47 = arith.constant dense<0.000000e+00> : vector<32x256xf32>
    %65 = tpu.matmul %64, %62, %cst_47 {dimension_numbers = #tpu.dot_dimension_numbers<[1], [0], [0], [1], [0, 0, 1, 1], [], []>} : vector<32x32xf32>, vector<32x256xf32>, vector<32x256xf32> -> vector<32x256xf32>
    %c6_48 = arith.constant 6 : index
    %c0_49 = arith.constant 0 : index
    %c0_50 = arith.constant 0 : index
    %66 = vector.load %arg5[%c6_48, %c0_49, %c0_50] : memref<7x32x1xf32, #tpu.memory_space<vmem>>, vector<1x32x1xf32>
    %67 = vector.shape_cast %66 : vector<1x32x1xf32> to vector<32x1xf32>
    %68 = vector.broadcast %67 : vector<32x1xf32> to vector<32x256xf32>
    %69 = arith.addf %65, %68 : vector<32x256xf32>
    %70 = math.tanh %69 : vector<32x256xf32>
    %c0_51 = arith.constant 0 : index
    %c0_52 = arith.constant 0 : index
    %71 = vector.load %arg6[%c0_51, %c0_52] : memref<32x1xf32, #tpu.memory_space<vmem>>, vector<32x1xf32>
    %72 = vector.broadcast %71 : vector<32x1xf32> to vector<32x256xf32>
    %73 = arith.mulf %70, %72 : vector<32x256xf32>
    %cst_53 = arith.constant dense<0.000000e+00> : vector<256xf32>
    %74 = vector.multi_reduction <add>, %73, %cst_53 [0] : vector<32x256xf32> to vector<256xf32>
    %75 = vector.shape_cast %74 : vector<256xf32> to vector<1x256xf32>
    %c0_54 = arith.constant 0 : index
    %c0_55 = arith.constant 0 : index
    %76 = vector.load %arg7[%c0_54, %c0_55] : memref<1x1xf32, #tpu.memory_space<vmem>>, vector<1x1xf32>
    %77 = vector.broadcast %76 : vector<1x1xf32> to vector<1x256xf32>
    %78 = arith.addf %75, %77 : vector<1x256xf32>
    %c0_56 = arith.constant 0 : index
    %c0_57 = arith.constant 0 : index
    %79 = vector.load %arg8[%c0_56, %c0_57] : memref<1x256xf32, #tpu.memory_space<vmem>>, vector<1x256xf32>
    tpu.vector_store %arg8[%c0_56, %c0_57], %78 {strides = array<i32>} : memref<1x256xf32, #tpu.memory_space<vmem>>, vector<1x256xf32>,
    return
  }
  func.func @transform_0(%arg0: i32) -> (i32, i32) {
    %c0_i32 = arith.constant 0 : i32
    %c0_i32_0 = arith.constant 0 : i32
    return %c0_i32, %arg0 : i32, i32
  }
  func.func @transform_1(%arg0: i32) -> (i32, i32) {
    %c0_i32 = arith.constant 0 : i32
    %c0_i32_0 = arith.constant 0 : i32
    %c0_i32_1 = arith.constant 0 : i32
    return %c0_i32, %c0_i32_0 : i32, i32
  }
  func.func @transform_2(%arg0: i32) -> (i32, i32) {
    %c0_i32 = arith.constant 0 : i32
    %c0_i32_0 = arith.constant 0 : i32
    %c0_i32_1 = arith.constant 0 : i32
    return %c0_i32, %c0_i32_0 : i32, i32
  }
  func.func @transform_3(%arg0: i32) -> (i32, i32, i32) {
    %c0_i32 = arith.constant 0 : i32
    %c0_i32_0 = arith.constant 0 : i32
    %c0_i32_1 = arith.constant 0 : i32
    %c0_i32_2 = arith.constant 0 : i32
    return %c0_i32, %c0_i32_0, %c0_i32_1 : i32, i32, i32
  }
  func.func @transform_4(%arg0: i32) -> (i32, i32, i32) {
    %c0_i32 = arith.constant 0 : i32
    %c0_i32_0 = arith.constant 0 : i32
    %c0_i32_1 = arith.constant 0 : i32
    %c0_i32_2 = arith.constant 0 : i32
    return %c0_i32, %c0_i32_0, %c0_i32_1 : i32, i32, i32
  }
  func.func @transform_5(%arg0: i32) -> (i32, i32) {
    %c0_i32 = arith.constant 0 : i32
    %c0_i32_0 = arith.constant 0 : i32
    %c0_i32_1 = arith.constant 0 : i32
    return %c0_i32, %c0_i32_0 : i32, i32
  }
  func.func @transform_6(%arg0: i32) -> (i32, i32) {
    %c0_i32 = arith.constant 0 : i32
    %c0_i32_0 = arith.constant 0 : i32
    %c0_i32_1 = arith.constant 0 : i32
    return %c0_i32, %c0_i32_0 : i32, i32
  }
  func.func @transform_7(%arg0: i32) -> (i32, i32) {
    %c0_i32 = arith.constant 0 : i32
    %c0_i32_0 = arith.constant 0 : i32
    return %c0_i32, %arg0 : i32, i32
  }
}

</mosaic_0001>

<bundles_post_ra>
// kernel: pinn_forward.1
= control target key start
LH: loop header
LB: loop body
LE: loop exit
PB: predicated region body
PF: predicated region fallthrough
CT: control target
= control target key end

     0   :  { %s1866_s26 = smov 0   ;;  %s2161_s0 = inlined_call_operand.vmem [shape: f32[2,768], index: 0, kind: input, shape index: {}]   ;;  %s2162_s1 = inlined_call_operand.vmem [shape: f32[32,2], index: 1, kind: input, shape index: {}]   ;;  %s2163_s2 = inlined_call_operand.vmem [shape: f32[32,1], index: 2, kind: input, shape index: {}]   ;;  %s2164_s3 = inlined_call_operand.vmem [shape: f32[7,32,32], index: 3, kind: input, shape index: {}]   ;;  %s2165_s4 = inlined_call_operand.vmem [shape: f32[7,32,1], index: 4, kind: input, shape index: {}]   ;;  %s2166_s5 = inlined_call_operand.vmem [shape: f32[32,1], index: 5, kind: input, shape index: {}]   ;;  %s2167_s6 = inlined_call_operand.<no memory space> [shape: f32[1,1], index: 6, kind: input, shape index: {}]   ;;  %s2168_s7 = inlined_call_operand.vmem [shape: f32[1,768], index: 7, kind: output, shape index: {}]  }
   0x1   :  { %v12_v0 = vstv %s2167_s6 }
   0x2   :  { %13 = vst [vmem:[#allocation2] sm:$0x1] %v12_v0 }
   0x3 LB: > { %s1518_s27 = sadd.s32 4294967295, %s1817_s26   ;;  %p1522_p0 = scmp.ge.s32.totalorder %s1817_s26, 1  ;;  %s1817_s26 = sphi %s1866_s26, %s19_s26  }
   0x4   : > { %p240_p1 = scmp.lt.s32.totalorder %s1817_s26, 4 }
   0x6   : > { %p241_p2 = pnand %p1522_p0, %p240_p1 }
   0x7   : > { %v287_v1 = vld [vmem:[%s2162_s1 + $0x10] sm:$0xff] (!%p241_p2)  ;;  %v285_v2 = vld [vmem:[%s2162_s1] sm:$0xff] (!%p241_p2)  ;;  %v1819_v3 = vmov (!%p241_p2), 1   ;;  %v286_v4 = vld [vmem:[%s2162_s1 + $0x8] sm:$0xff] (!%p241_p2)  ;;  %v1820_v5 = vmov (!%p241_p2), 0   ;;  %v1821_v23 = vmov (!%p241_p2), 0.0   ;;  %v310_v45 = vlaneseq (!%p241_p2) }
   0x8   : > { %244 = sbr.rel (%p241_p2) target bundleno = 1908 (0x774), region = 48  ;;  %1679 = vset.pattern.permute.xlu0 (!%p241_p2), %v1819_v3  ;;  %1677 = vset.pattern.permute.xlu1 (!%p241_p2), %v1819_v3  ;;  %v288_v6 = vld [vmem:[%s2162_s1 + $0x18] sm:$0xff] (!%p241_p2)  ;;  %v372_v7 = vld [vmem:[%s2163_s2 + $0x8] sm:$0xff] (!%p241_p2)  ;;  %v371_v8 = vld [vmem:[%s2163_s2] sm:$0xff] (!%p241_p2)  ;;  %s1523_s18 = sshll.u32 (!%p241_p2), %s1518_s27, 1  ;;  %vm439_vm0 = vcmask (!%p241_p2), 261120  }
   0x9   : > { %337 = vperm.xlu0 (!%p241_p2), %1679, %v287_v1   ;;  %329 = vperm.xlu1 (!%p241_p2), %1677, %v285_v2   ;;  %v415_v9 = vld [vmem:[%s2165_s4] sm:$0xff] (!%p241_p2)  ;;  %v373_v10 = vld [vmem:[%s2163_s2 + $0x10] sm:$0xff] (!%p241_p2)  ;;  %v374_v12 = vld [vmem:[%s2163_s2 + $0x18] sm:$0xff] (!%p241_p2)  ;;  %p272_p3 = scmp.lt.s32.totalorder (!%p241_p2), %s1523_s18, 5  ;;  %v2002_v48 = vshrl.u32 (!%p241_p2), %v310_v45, 7  ;;  %vm1465_vm1 = vcmp.lt.s32.totalorder (!%p241_p2), %v310_v45, 256 }
   0xa   : > { %v417_v11 = vld [vmem:[%s2165_s4 + $0x10] sm:$0xff] (!%p241_p2)  ;;  %v1535_v13 = vld [vmem:[%s2165_s4 + $0x20] sm:$0xff] (!%p241_p2)  ;;  %v416_v14 = vld [vmem:[%s2165_s4 + $0x8] sm:$0xff] (!%p241_p2)  ;;  %516 = vmatprep.mubr.f32.mxu0 (!%p241_p2), %v1821_v23  ;;  %528 = vmatprep.mubr.f32.mxu1 (!%p241_p2), %v1821_v23 }
   0xb   : > { %v1537_v15 = vld [vmem:[%s2165_s4 + $0x30] sm:$0xff] (!%p241_p2)  ;;  %v418_v16 = vld [vmem:[%s2165_s4 + $0x18] sm:$0xff] (!%p241_p2)  ;;  %v1547_v17 = vld [vmem:[%s2165_s4 + $0x40] sm:$0xff] (!%p241_p2)  ;;  %v2008_v52 = vsub.s32 (!%p241_p2), 0, %v2002_v48  ;;  %v316_v53 = vsub.s32 (!%p241_p2), 1, %v2002_v48 }
   0xc   : > { %v1536_v18 = vld [vmem:[%s2165_s4 + $0x28] sm:$0xff] (!%p241_p2)  ;;  %v1549_v19 = vld [vmem:[%s2165_s4 + $0x50] sm:$0xff] (!%p241_p2)  ;;  %v1538_v20 = vld [vmem:[%s2165_s4 + $0x38] sm:$0xff] (!%p241_p2) }
   0xd   : > { %1680 = vset.pattern.permute.xlu0 (!%p241_p2), %v1820_v5  ;;  %333 = vperm.xlu1 (!%p241_p2), %1677, %v286_v4   ;;  %v1559_v21 = vld [vmem:[%s2165_s4 + $0x60] sm:$0xff] (!%p241_p2)  ;;  %v1548_v22 = vld [vmem:[%s2165_s4 + $0x48] sm:$0xff] (!%p241_p2)  ;;  %v1561_v24 = vld [vmem:[%s2165_s4 + $0x70] sm:$0xff] (!%p241_p2) }
   0xe   : > { %291 = vperm.xlu0 (!%p241_p2), %1680, %v285_v2   ;;  %v1550_v25 = vld [vmem:[%s2165_s4 + $0x58] sm:$0xff] (!%p241_p2)  ;;  %v1571_v26 = vld [vmem:[%s2165_s4 + $0x80] sm:$0xff] (!%p241_p2)  ;;  %v1560_v27 = vld [vmem:[%s2165_s4 + $0x68] sm:$0xff] (!%p241_p2) }
   0xf   : > { %v1573_v28 = vld [vmem:[%s2165_s4 + $0x90] sm:$0xff]  ;;  %v1562_v29 = vld [vmem:[%s2165_s4 + $0x78] sm:$0xff]  ;;  %v1583_v30 = vld [vmem:[%s2165_s4 + $0xa0] sm:$0xff]  ;;  %s2170_s18 = smov (!%p272_p3, %s1523_s18), 5 }
  0x10   : > { %v1572_v31 = vld [vmem:[%s2165_s4 + $0x88] sm:$0xff]  ;;  %v1585_v32 = vld [vmem:[%s2165_s4 + $0xb0] sm:$0xff]  ;;  %v1574_v33 = vld [vmem:[%s2165_s4 + $0x98] sm:$0xff]  ;;  %s1524_s19 = sshll.u32 %s2170_s18, 1  ;;  %s280_s14 = scalar_lea.vmem %s2168_s7, %s2170_s18 }
  0x11   : > { %1678 = vset.pattern.permute.xlu1 %v1820_v5  ;;  %v1595_v34 = vld [vmem:[%s2165_s4 + $0xc0] sm:$0xff]  ;;  %v1584_v35 = vld [vmem:[%s2165_s4 + $0xa8] sm:$0xff]  ;;  %v1597_v36 = vld [vmem:[%s2165_s4 + $0xd0] sm:$0xff]  ;;  %s275_s22 = scalar_lea.vmem %s2161_s0, %s1524_s19 }
  0x12   : > { %296 = vperm.xlu0 %1680, %v286_v4   ;;  %306 = vperm.xlu1 %1678, %v288_v6   ;;  %v1586_v37 = vld [vmem:[%s2165_s4 + $0xb8] sm:$0xff]  ;;  %v1383_v38 = vld [vmem:[%s2166_s5] sm:$0xff]  ;;  %v1596_v39 = vld [vmem:[%s2165_s4 + $0xc8] sm:$0xff] }
  0x13   : > { %v1385_v40 = vld [vmem:[%s2166_s5 + $0x10] sm:$0xff]  ;;  %v1598_v41 = vld [vmem:[%s2165_s4 + $0xd8] sm:$0xff]  ;;  %v1433_v42 = vld [vmem:[#allocation2] sm:$0x1] }
  0x14   : > { %v1384_v43 = vld [vmem:[%s2166_s5 + $0x8] sm:$0xff]  ;;  %v1386_v44 = vld [vmem:[%s2166_s5 + $0x18] sm:$0xff]  ;;  %v282_v51 = vld [vmem:[%s275_s22] ss:$2 sm:$0x3] }
  0x15   : > { %v1526_v54 = vld [vmem:[%s275_s22 + $0x1] ss:$2 sm:$0x3]  ;;  %v313_v55 = vrot.slane %v282_v51, %v2008_v52  ;;  %v317_v58 = vrot.slane %v282_v51, %v316_v53  ;;  %v413_v51 = vld [vmem:[%s2164_s3 + $0x10] sm:$0xff] }
  0x16   : > { %301 = vperm.xlu0 %1680, %v287_v1   ;;  %1681 = vset.pattern.permute.xlu1 %v1819_v3  ;;  %v348_v59 = vrot.slane %v1526_v54, %v2008_v52  ;;  %v352_v60 = vrot.slane %v1526_v54, %v316_v53  ;;  %v412_v53 = vld [vmem:[%s2164_s3 + $0x8] sm:$0xff]  ;;  %v414_v54 = vld [vmem:[%s2164_s3 + $0x18] sm:$0xff] }
  0x17   : > { %341 = vperm.xlu1 %1681, %v288_v6  }
  0x1a   : > { %382 = vperm.xlu0 %1680, %v372_v7  }
  0x1b   : > { %1682 = vset.pattern.permute.xlu1 %v1820_v5 }
  0x1c   : > { %377 = vperm.xlu1 %1682, %v371_v8  }
  0x1e   : > { %421 = vperm.xlu0 %1680, %v415_v9  }
  0x20   : > { %387 = vperm.xlu1 %1682, %v373_v10  }
  0x22   : > { %431 = vperm.xlu0 %1680, %v417_v11  }
  0x24   : > { %392 = vperm.xlu1 %1682, %v374_v12  }
  0x26   : > { %561 = vperm.xlu0 %1680, %v1535_v13  }
  0x28   : > { %426 = vperm.xlu1 %1682, %v416_v14  }
  0x2a   : > { %571 = vperm.xlu0 %1680, %v1537_v15  }
  0x2c   : > { %436 = vperm.xlu1 %1682, %v418_v16  }
  0x2e   : > { %700 = vperm.xlu0 %1680, %v1547_v17  }
  0x30   : > { %566 = vperm.xlu1 %1682, %v1536_v18  }
  0x32   : > { %710 = vperm.xlu0 %1680, %v1549_v19  }
  0x34   : > { %576 = vperm.xlu1 %1682, %v1538_v20  }
  0x36   : > { %839 = vperm.xlu0 %1680, %v1559_v21  }
  0x38   : > { %705 = vperm.xlu1 %1682, %v1548_v22  }
  0x3a   : > { %849 = vperm.xlu0 %1680, %v1561_v24  }
  0x3c   : > { %715 = vperm.xlu1 %1682, %v1550_v25  }
  0x3e   : > { %978 = vperm.xlu0 %1680, %v1571_v26  }
  0x40   : > { %844 = vperm.xlu1 %1682, %v1560_v27  }
  0x42   : > { %988 = vperm.xlu0 %1680, %v1573_v28  }
  0x44   : > { %854 = vperm.xlu1 %1682, %v1562_v29  }
  0x46   : > { %1117 = vperm.xlu0 %1680, %v1583_v30  }
  0x48   : > { %983 = vperm.xlu1 %1682, %v1572_v31  }
  0x4a   : > { %1127 = vperm.xlu0 %1680, %v1585_v32  }
  0x4c   : > { %993 = vperm.xlu1 %1682, %v1574_v33  }
  0x4e   : > { %1256 = vperm.xlu0 %1680, %v1595_v34  }
  0x50   : > { %1122 = vperm.xlu1 %1682, %v1584_v35  }
  0x52   : > { %1266 = vperm.xlu0 %1680, %v1597_v36  }
  0x54   : > { %1132 = vperm.xlu1 %1682, %v1586_v37  }
  0x56   : > { %1389 = vperm.xlu0 %1680, %v1383_v38  }
  0x58   : > { %1261 = vperm.xlu1 %1682, %v1596_v39  }
  0x5a   : > { %1399 = vperm.xlu0 %1680, %v1385_v40  }
  0x5c   : > { %1271 = vperm.xlu1 %1682, %v1598_v41  }
  0x5e   : > { %1436 = vperm.xlu0 %1680, %v1433_v42  }
  0x60   : > { %1394 = vperm.xlu1 %1682, %v1384_v43  }
  0x64   : > { %1404 = vperm.xlu1 %1682, %v1386_v44  }
  0x88   : > { %v330_v46 = vpop.permute.xlu1 %329  ;;  %v338_v47 = vpop.permute.xlu0 %337 }
  0x89   : > { %v355_v5 = vmul.f32 %v348_v59, %v330_v46  ;;  %v356_v6 = vmul.f32 %v352_v60, %v330_v46  ;;  %v359_v17 = vmul.f32 %v348_v59, %v338_v47  ;;  %v360_v20 = vmul.f32 %v352_v60, %v338_v47 }
  0x8c   : > { %v334_v49 = vpop.permute.xlu1 %333 }
  0x8d   : > { %v292_v50 = vpop.permute.xlu0 %291  ;;  %v357_v1 = vmul.f32 %v348_v59, %v334_v49  ;;  %v358_v2 = vmul.f32 %v352_v60, %v334_v49 }
  0x8e   : > { %v320_v63 = vmul.f32 %v313_v55, %v292_v50  ;;  %v321_v3 = vmul.f32 %v317_v58, %v292_v50  ;;  %v411_v50 = vld [vmem:[%s2164_s3] sm:$0xff] }
  0x90   : > { %v363_v10 = vadd.f32 %v355_v5, %v320_v63  ;;  %v364_v14 = vadd.f32 %v356_v6, %v321_v3 }
  0x91   : > { %v297_v56 = vpop.permute.xlu0 %296  ;;  %v307_v57 = vpop.permute.xlu1 %306 }
  0x92   : > { %v322_v61 = vmul.f32 %v313_v55, %v297_v56  ;;  %v323_v62 = vmul.f32 %v317_v58, %v297_v56  ;;  %v326_v27 = vmul.f32 %v313_v55, %v307_v57  ;;  %v327_v28 = vmul.f32 %v317_v58, %v307_v57 }
  0x94   : > { %v365_v7 = vadd.f32 %v357_v1, %v322_v61  ;;  %v366_v8 = vadd.f32 %v358_v2, %v323_v62 }
  0x95   : > { %v302_v0 = vpop.permute.xlu0 %301 }
  0x96   : > { %v342_v4 = vpop.permute.xlu1 %341  ;;  %v324_v11 = vmul.f32 %v313_v55, %v302_v0  ;;  %v325_v15 = vmul.f32 %v317_v58, %v302_v0 }
  0x97   : > { %v361_v21 = vmul.f32 %v348_v59, %v342_v4  ;;  %v362_v22 = vmul.f32 %v352_v60, %v342_v4 }
  0x98   : > { %v367_v24 = vadd.f32 %v359_v17, %v324_v11  ;;  %v368_v26 = vadd.f32 %v360_v20, %v325_v15 }
  0x99   : > { %v383_v9 = vpop.permute.xlu0 %382  ;;  %v369_v31 = vadd.f32 %v361_v21, %v326_v27  ;;  %v370_v32 = vadd.f32 %v362_v22, %v327_v28  ;;  %v1534_v27 = vld [vmem:[%s2164_s3 + $0x38] sm:$0xff] }
  0x9a   : > { %v397_v12 = vadd.f32 %v383_v9, %v365_v7  ;;  %v398_v13 = vadd.f32 %v383_v9, %v366_v8 }
  0x9b   : > { %v378_v16 = vpop.permute.xlu1 %377 }
  0x9c   : > { %1683 = vtanh.f32 %v397_v12  ;;  %v395_v18 = vadd.f32 %v378_v16, %v363_v10  ;;  %v396_v19 = vadd.f32 %v378_v16, %v364_v14 }
  0x9d   : > { %1685 = vtanh.f32 %v398_v13  ;;  %v422_v55 = vpop.permute.xlu0 %421 }
  0x9e   : > { %1687 = vtanh.f32 %v395_v18 }
  0x9f   : > { %1689 = vtanh.f32 %v396_v19  ;;  %v388_v25 = vpop.permute.xlu1 %387 }
  0xa0   : > { %v399_v29 = vadd.f32 %v388_v25, %v367_v24  ;;  %v400_v30 = vadd.f32 %v388_v25, %v368_v26  ;;  %v1531_v24 = vld [vmem:[%s2164_s3 + $0x20] sm:$0xff]  ;;  %v1532_v25 = vld [vmem:[%s2164_s3 + $0x28] sm:$0xff]  ;;  %v1533_v26 = vld [vmem:[%s2164_s3 + $0x30] sm:$0xff] }
  0xa1   : > { %v432_v57 = vpop.permute.xlu0 %431 }
  0xa2   : > { %1691 = vtanh.f32 %v399_v29 }
  0xa3   : > { %v393_v33 = vpop.permute.xlu1 %392  ;;  %1693 = vtanh.f32 %v400_v30 }
  0xa4   : > { %v401_v34 = vadd.f32 %v393_v33, %v369_v31  ;;  %v402_v35 = vadd.f32 %v393_v33, %v370_v32 }
  0xa5   : > { %v562_v28 = vpop.permute.xlu0 %561 }
  0xa6   : > { %v1684_v36 = vpop.eup %1683  ;;  %1695 = vtanh.f32 %v401_v34 }
  0xa7   : > { %v1686_v37 = vpop.eup %1685  ;;  %1697 = vtanh.f32 %v402_v35  ;;  %v427_v56 = vpop.permute.xlu1 %426 }
  0xa8   : > { %v1688_v38 = vpop.eup %1687 }
  0xa9   : > { %v1690_v39 = vpop.eup %1689  ;;  %v1607_v40 = vpack.c.bf16 %v1684_v36, %v1688_v38  ;;  %v572_v38 = vpop.permute.xlu0 %571 }
  0xaa   : > { %v1605_v41 = vpack.c.bf16 %v1686_v37, %v1690_v39 }
  0xab   : > { %v437_v2 = vpop.permute.xlu1 %436 }
  0xac   : > { %1606 = vmatprep.subr.bf16.mxu0 %v1605_v41  ;;  %1661 = vmatprep.subr.bf16.mxu1 %v1605_v41  ;;  %v1692_v42 = vpop.eup %1691 }
  0xad   : > { %1608 = vmatpush1.bf16.msra.mxu0 %v1607_v40  ;;  %1663 = vmatpush1.bf16.msra.mxu1 %v1607_v40  ;;  %v1694_v43 = vpop.eup %1693 }
  0xaf   : > { %v567_v33 = vpop.permute.xlu1 %566 }
  0xb0   : > { %v1696_v44 = vpop.eup %1695 }
  0xb1   : > { %v1698_v46 = vpop.eup %1697  ;;  %v1611_v47 = vpack.c.bf16 %v1696_v44, %v1692_v42 }
  0xb2   : > { %v1609_v49 = vpack.c.bf16 %v1698_v46, %v1694_v43 }
  0xb3   : > { %v577_v43 = vpop.permute.xlu1 %576 }
  0xb4   : > { %1610 = vmatprep.subr.bf16.mxu0 %v1609_v49  ;;  %1662 = vmatprep.subr.bf16.mxu1 %v1609_v49 }
  0xb5   : > { %1612 = vmatpush1.bf16.msra.mxu0 %v1611_v47  ;;  %1664 = vmatpush1.bf16.msra.mxu1 %v1611_v47 }
  0xb8   : > { %1527 = vmatmul.mubr.msk.f32.vlgmr.msra.gmra.mrb[0].mxu0 %vm439_vm0, %v411_v50  ;;  %1529 = vmatmul.mubr.msk.f32.vlgmr.msra.gmra.mrb[0].mxu1 %vm439_vm0, %v413_v51 }
  0xb9   : > { %522 = vmatprep.mubr.f32.mxu0 %v1821_v23  ;;  %534 = vmatprep.mubr.f32.mxu1 %v1821_v23 }
  0xbc   : > { %1528 = vmatmul.mubr.msk.f32.gmra.mrb[2].mxu0 %vm439_vm0, %v412_v53  ;;  %1530 = vmatmul.mubr.msk.f32.gmra.mrb[2].mxu1 %vm439_vm0, %v414_v54 }
  0xbd   : > { %655 = vmatprep.mubr.f32.mxu1 %v1821_v23  ;;  %794 = vmatprep.mubr.f32.mxu0 %v1821_v23 }
 0x18b   : > { %v518_v58 = vpop.f32.mrb[0].mxu0  ;;  %v530_v59 = vpop.f32.mrb[0].mxu1 }
 0x18c   : > { %v519_v60 = vadd.f32 %v518_v58, %v422_v55  ;;  %v531_v61 = vadd.f32 %v530_v59, %v432_v57  ;;  %v520_v62 = vpop.f32.mrb[1].mxu0  ;;  %v532_v63 = vpop.f32.mrb[1].mxu1 }
 0x18d   : > { %v521_v0 = vadd.f32 %v520_v62, %v422_v55  ;;  %v533_v1 = vadd.f32 %v532_v63, %v432_v57  ;;  %v1543_v63 = vld [vmem:[%s2164_s3 + $0x40] sm:$0xff] }
 0x18e   : > { %1699 = vtanh.f32 %v519_v60 }
 0x18f   : > { %1701 = vtanh.f32 %v531_v61  ;;  %v524_v3 = vpop.f32.mrb[2].mxu0  ;;  %v536_v4 = vpop.f32.mrb[2].mxu1 }
 0x190   : > { %1703 = vtanh.f32 %v521_v0  ;;  %v525_v5 = vadd.f32 %v524_v3, %v427_v56  ;;  %v537_v6 = vadd.f32 %v536_v4, %v437_v2  ;;  %v526_v7 = vpop.f32.mrb[3].mxu0  ;;  %v538_v8 = vpop.f32.mrb[3].mxu1  ;;  %v1544_v0 = vld [vmem:[%s2164_s3 + $0x48] sm:$0xff] }
 0x191   : > { %1705 = vtanh.f32 %v533_v1  ;;  %v527_v9 = vadd.f32 %v526_v7, %v427_v56  ;;  %v539_v10 = vadd.f32 %v538_v8, %v437_v2  ;;  %v1545_v1 = vld [vmem:[%s2164_s3 + $0x50] sm:$0xff]  ;;  %v1546_v2 = vld [vmem:[%s2164_s3 + $0x58] sm:$0xff]  ;;  %v701_v3 = vpop.permute.xlu0 %700  ;;  %v706_v8 = vpop.permute.xlu1 %705 }
 0x192   : > { %1707 = vtanh.f32 %v525_v5 }
 0x193   : > { %1709 = vtanh.f32 %v537_v6 }
 0x194   : > { %1711 = vtanh.f32 %v527_v9 }
 0x195   : > { %1713 = vtanh.f32 %v539_v10 }
 0x198   : > { %v1700_v11 = vpop.eup %1699 }
 0x199   : > { %v1702_v12 = vpop.eup %1701 }
 0x19a   : > { %v1704_v13 = vpop.eup %1703 }
 0x19b   : > { %v1706_v14 = vpop.eup %1705 }
 0x19c   : > { %v1708_v15 = vpop.eup %1707 }
 0x19d   : > { %v1710_v16 = vpop.eup %1709  ;;  %v1615_v17 = vpack.c.bf16 %v1708_v15, %v1700_v11 }
 0x19e   : > { %v1712_v18 = vpop.eup %1711  ;;  %v1619_v19 = vpack.c.bf16 %v1710_v16, %v1702_v12 }
 0x19f   : > { %v1714_v20 = vpop.eup %1713  ;;  %v1613_v21 = vpack.c.bf16 %v1712_v18, %v1704_v13  ;;  %v711_v13 = vpop.permute.xlu0 %710 }
 0x1a0   : > { %v1617_v22 = vpack.c.bf16 %v1714_v20, %v1706_v14  ;;  %v716_v18 = vpop.permute.xlu1 %715 }
 0x1a1   : > { %1614 = vmatprep.subr.bf16.mxu1 %v1613_v21 }
 0x1a2   : > { %1616 = vmatpush1.bf16.msra.mxu1 %v1615_v17 }
 0x1a3   : > { %1618 = vmatprep.subr.bf16.mxu1 %v1617_v22 }
 0x1a6   : > { %1620 = vmatpush1.bf16.msra.mxu1 %v1619_v19 }
 0x1a9   : > { %1539 = vmatmul.mubr.msk.f32.vlgmr.msra.gmra.mrb[4].mxu1 %vm439_vm0, %v1531_v24 }
 0x1aa   : > { %661 = vmatprep.mubr.f32.mxu1 %v1821_v23 }
 0x1ad   : > { %1540 = vmatmul.mubr.msk.f32.gmra.mrb[6].mxu1 %vm439_vm0, %v1532_v25 }
 0x1ae   : > { %667 = vmatprep.mubr.f32.mxu1 %v1821_v23 }
 0x1b1   : > { %1541 = vmatmul.mubr.msk.f32.gmra.mrb[8].mxu1 %vm439_vm0, %v1533_v26 }
 0x1b2   : > { %673 = vmatprep.mubr.f32.mxu1 %v1821_v23 }
 0x1b5   : > { %1542 = vmatmul.mubr.msk.f32.gmra.mrb[10].mxu1 %vm439_vm0, %v1534_v27 }
 0x1b6   : > { %933 = vmatprep.mubr.f32.mxu1 %v1821_v23 }
 0x27c   : > { %v657_v29 = vpop.f32.mrb[4].mxu1 }
 0x27d   : > { %v658_v30 = vadd.f32 %v657_v29, %v562_v28  ;;  %v659_v31 = vpop.f32.mrb[5].mxu1 }
 0x27e   : > { %v660_v32 = vadd.f32 %v659_v31, %v562_v28 }
 0x27f   : > { %1715 = vtanh.f32 %v658_v30 }
 0x280   : > { %v663_v34 = vpop.f32.mrb[6].mxu1  ;;  %1717 = vtanh.f32 %v660_v32 }
 0x281   : > { %v664_v35 = vadd.f32 %v663_v34, %v567_v33  ;;  %v665_v36 = vpop.f32.mrb[7].mxu1 }
 0x282   : > { %v666_v37 = vadd.f32 %v665_v36, %v567_v33  ;;  %v1555_v36 = vld [vmem:[%s2164_s3 + $0x60] sm:$0xff] }
 0x283   : > { %1719 = vtanh.f32 %v664_v35 }
 0x284   : > { %1721 = vtanh.f32 %v666_v37  ;;  %v669_v39 = vpop.f32.mrb[8].mxu1  ;;  %v1556_v37 = vld [vmem:[%s2164_s3 + $0x68] sm:$0xff] }
 0x285   : > { %v670_v40 = vadd.f32 %v669_v39, %v572_v38  ;;  %v671_v41 = vpop.f32.mrb[9].mxu1  ;;  %v1558_v39 = vld [vmem:[%s2164_s3 + $0x78] sm:$0xff] }
 0x286   : > { %v672_v42 = vadd.f32 %v671_v41, %v572_v38  ;;  %v1557_v38 = vld [vmem:[%s2164_s3 + $0x70] sm:$0xff] }
 0x287   : > { %1723 = vtanh.f32 %v670_v40  ;;  %v840_v40 = vpop.permute.xlu0 %839 }
 0x288   : > { %v675_v44 = vpop.f32.mrb[10].mxu1  ;;  %1725 = vtanh.f32 %v672_v42 }
 0x289   : > { %v676_v46 = vadd.f32 %v675_v44, %v577_v43  ;;  %v677_v47 = vpop.f32.mrb[11].mxu1  ;;  %v1716_v50 = vpop.eup %1715 }
 0x28a   : > { %v678_v49 = vadd.f32 %v677_v47, %v577_v43  ;;  %v1718_v51 = vpop.eup %1717 }
 0x28b   : > { %1727 = vtanh.f32 %v676_v46  ;;  %v845_v46 = vpop.permute.xlu1 %844 }
 0x28c   : > { %1729 = vtanh.f32 %v678_v49 }
 0x28d   : > { %v1720_v53 = vpop.eup %1719 }
 0x28e   : > { %v1722_v54 = vpop.eup %1721  ;;  %v1623_v55 = vpack.c.bf16 %v1720_v53, %v1716_v50  ;;  %v850_v53 = vpop.permute.xlu0 %849 }
 0x28f   : > { %v1621_v56 = vpack.c.bf16 %v1722_v54, %v1718_v51 }
 0x291   : > { %1622 = vmatprep.subr.bf16.mxu0 %v1621_v56  ;;  %v1724_v57 = vpop.eup %1723 }
 0x292   : > { %1624 = vmatpush1.bf16.msra.mxu0 %v1623_v55  ;;  %v1726_v58 = vpop.eup %1725 }
 0x295   : > { %v1728_v59 = vpop.eup %1727 }
 0x296   : > { %v1730_v60 = vpop.eup %1729  ;;  %v1627_v61 = vpack.c.bf16 %v1728_v59, %v1724_v57 }
 0x297   : > { %v1625_v62 = vpack.c.bf16 %v1730_v60, %v1726_v58  ;;  %v855_v58 = vpop.permute.xlu1 %854 }
 0x299   : > { %1626 = vmatprep.subr.bf16.mxu0 %v1625_v62 }
 0x29a   : > { %1628 = vmatpush1.bf16.msra.mxu0 %v1627_v61 }
 0x29d   : > { %1551 = vmatmul.mubr.msk.f32.vlgmr.msra.gmra.mrb[4].mxu0 %vm439_vm0, %v1543_v63 }
 0x29e   : > { %800 = vmatprep.mubr.f32.mxu0 %v1821_v23 }
 0x2a1   : > { %1552 = vmatmul.mubr.msk.f32.gmra.mrb[6].mxu0 %vm439_vm0, %v1544_v0 }
 0x2a2   : > { %806 = vmatprep.mubr.f32.mxu0 %v1821_v23 }
 0x2a5   : > { %1553 = vmatmul.mubr.msk.f32.gmra.mrb[8].mxu0 %vm439_vm0, %v1545_v1 }
 0x2a6   : > { %812 = vmatprep.mubr.f32.mxu0 %v1821_v23 }
 0x2a9   : > { %1554 = vmatmul.mubr.msk.f32.gmra.mrb[10].mxu0 %vm439_vm0, %v1546_v2 }
 0x2aa   : > { %1072 = vmatprep.mubr.f32.mxu0 %v1821_v23 }
 0x370   : > { %v796_v4 = vpop.f32.mrb[4].mxu0 }
 0x371   : > { %v797_v5 = vadd.f32 %v796_v4, %v701_v3  ;;  %v798_v6 = vpop.f32.mrb[5].mxu0 }
 0x372   : > { %v799_v7 = vadd.f32 %v798_v6, %v701_v3 }
 0x373   : > { %1731 = vtanh.f32 %v797_v5 }
 0x374   : > { %v802_v9 = vpop.f32.mrb[6].mxu0  ;;  %1733 = vtanh.f32 %v799_v7 }
 0x375   : > { %v803_v10 = vadd.f32 %v802_v9, %v706_v8  ;;  %v804_v11 = vpop.f32.mrb[7].mxu0 }
 0x376   : > { %v805_v12 = vadd.f32 %v804_v11, %v706_v8  ;;  %v1567_v11 = vld [vmem:[%s2164_s3 + $0x80] sm:$0xff] }
 0x377   : > { %1735 = vtanh.f32 %v803_v10 }
 0x378   : > { %1737 = vtanh.f32 %v805_v12  ;;  %v808_v14 = vpop.f32.mrb[8].mxu0  ;;  %v1568_v12 = vld [vmem:[%s2164_s3 + $0x88] sm:$0xff] }
 0x379   : > { %v809_v15 = vadd.f32 %v808_v14, %v711_v13  ;;  %v810_v16 = vpop.f32.mrb[9].mxu0  ;;  %v1570_v14 = vld [vmem:[%s2164_s3 + $0x98] sm:$0xff] }
 0x37a   : > { %v811_v17 = vadd.f32 %v810_v16, %v711_v13  ;;  %v1569_v13 = vld [vmem:[%s2164_s3 + $0x90] sm:$0xff] }
 0x37b   : > { %1739 = vtanh.f32 %v809_v15  ;;  %v979_v15 = vpop.permute.xlu0 %978 }
 0x37c   : > { %v814_v19 = vpop.f32.mrb[10].mxu0  ;;  %1741 = vtanh.f32 %v811_v17 }
 0x37d   : > { %v815_v20 = vadd.f32 %v814_v19, %v716_v18  ;;  %v816_v21 = vpop.f32.mrb[11].mxu0  ;;  %v1732_v24 = vpop.eup %1731 }
 0x37e   : > { %v817_v22 = vadd.f32 %v816_v21, %v716_v18  ;;  %v1734_v25 = vpop.eup %1733 }
 0x37f   : > { %1743 = vtanh.f32 %v815_v20  ;;  %v984_v20 = vpop.permute.xlu1 %983 }
 0x380   : > { %1745 = vtanh.f32 %v817_v22 }
 0x381   : > { %v1736_v26 = vpop.eup %1735 }
 0x382   : > { %v1738_v27 = vpop.eup %1737  ;;  %v1631_v28 = vpack.c.bf16 %v1736_v26, %v1732_v24  ;;  %v989_v26 = vpop.permute.xlu0 %988 }
 0x383   : > { %v1629_v29 = vpack.c.bf16 %v1738_v27, %v1734_v25 }
 0x385   : > { %1630 = vmatprep.subr.bf16.mxu1 %v1629_v29  ;;  %v1740_v30 = vpop.eup %1739 }
 0x386   : > { %1632 = vmatpush1.bf16.msra.mxu1 %v1631_v28  ;;  %v1742_v31 = vpop.eup %1741 }
 0x389   : > { %v1744_v32 = vpop.eup %1743 }
 0x38a   : > { %v1746_v33 = vpop.eup %1745  ;;  %v1635_v34 = vpack.c.bf16 %v1744_v32, %v1740_v30 }
 0x38b   : > { %v1633_v35 = vpack.c.bf16 %v1746_v33, %v1742_v31  ;;  %v994_v31 = vpop.permute.xlu1 %993 }
 0x38d   : > { %1634 = vmatprep.subr.bf16.mxu1 %v1633_v35 }
 0x38e   : > { %1636 = vmatpush1.bf16.msra.mxu1 %v1635_v34 }
 0x391   : > { %1563 = vmatmul.mubr.msk.f32.vlgmr.msra.gmra.mrb[12].mxu1 %vm439_vm0, %v1555_v36 }
 0x392   : > { %939 = vmatprep.mubr.f32.mxu1 %v1821_v23 }
 0x395   : > { %1564 = vmatmul.mubr.msk.f32.gmra.mrb[14].mxu1 %vm439_vm0, %v1556_v37 }
 0x396   : > { %945 = vmatprep.mubr.f32.mxu1 %v1821_v23 }
 0x399   : > { %1565 = vmatmul.mubr.msk.f32.gmra.mrb[16].mxu1 %vm439_vm0, %v1557_v38 }
 0x39a   : > { %951 = vmatprep.mubr.f32.mxu1 %v1821_v23 }
 0x39d   : > { %1566 = vmatmul.mubr.msk.f32.gmra.mrb[18].mxu1 %vm439_vm0, %v1558_v39 }
 0x39e   : > { %1211 = vmatprep.mubr.f32.mxu1 %v1821_v23 }
 0x464   : > { %v935_v41 = vpop.f32.mrb[12].mxu1 }
 0x465   : > { %v936_v42 = vadd.f32 %v935_v41, %v840_v40  ;;  %v937_v43 = vpop.f32.mrb[13].mxu1 }
 0x466   : > { %v938_v44 = vadd.f32 %v937_v43, %v840_v40 }
 0x467   : > { %1747 = vtanh.f32 %v936_v42 }
 0x468   : > { %v941_v47 = vpop.f32.mrb[14].mxu1  ;;  %1749 = vtanh.f32 %v938_v44 }
 0x469   : > { %v942_v49 = vadd.f32 %v941_v47, %v845_v46  ;;  %v943_v50 = vpop.f32.mrb[15].mxu1 }
 0x46a   : > { %v944_v51 = vadd.f32 %v943_v50, %v845_v46  ;;  %v1579_v50 = vld [vmem:[%s2164_s3 + $0xa0] sm:$0xff] }
 0x46b   : > { %1751 = vtanh.f32 %v942_v49 }
 0x46c   : > { %1753 = vtanh.f32 %v944_v51  ;;  %v947_v54 = vpop.f32.mrb[16].mxu1  ;;  %v1580_v51 = vld [vmem:[%s2164_s3 + $0xa8] sm:$0xff] }
 0x46d   : > { %v948_v55 = vadd.f32 %v947_v54, %v850_v53  ;;  %v949_v56 = vpop.f32.mrb[17].mxu1  ;;  %v1582_v54 = vld [vmem:[%s2164_s3 + $0xb8] sm:$0xff] }
 0x46e   : > { %v950_v57 = vadd.f32 %v949_v56, %v850_v53  ;;  %v1581_v53 = vld [vmem:[%s2164_s3 + $0xb0] sm:$0xff] }
 0x46f   : > { %1755 = vtanh.f32 %v948_v55  ;;  %v1118_v55 = vpop.permute.xlu0 %1117 }
 0x470   : > { %v953_v59 = vpop.f32.mrb[18].mxu1  ;;  %1757 = vtanh.f32 %v950_v57 }
 0x471   : > { %v954_v60 = vadd.f32 %v953_v59, %v855_v58  ;;  %v955_v61 = vpop.f32.mrb[19].mxu1  ;;  %v1748_v63 = vpop.eup %1747 }
 0x472   : > { %v956_v62 = vadd.f32 %v955_v61, %v855_v58  ;;  %v1750_v0 = vpop.eup %1749 }
 0x473   : > { %1759 = vtanh.f32 %v954_v60  ;;  %v1123_v60 = vpop.permute.xlu1 %1122 }
 0x474   : > { %1761 = vtanh.f32 %v956_v62 }
 0x475   : > { %v1752_v1 = vpop.eup %1751 }
 0x476   : > { %v1754_v2 = vpop.eup %1753  ;;  %v1639_v3 = vpack.c.bf16 %v1752_v1, %v1748_v63  ;;  %v1128_v1 = vpop.permute.xlu0 %1127 }
 0x477   : > { %v1637_v4 = vpack.c.bf16 %v1754_v2, %v1750_v0 }
 0x479   : > { %1638 = vmatprep.subr.bf16.mxu0 %v1637_v4  ;;  %v1756_v5 = vpop.eup %1755 }
 0x47a   : > { %1640 = vmatpush1.bf16.msra.mxu0 %v1639_v3  ;;  %v1758_v6 = vpop.eup %1757 }
 0x47d   : > { %v1760_v7 = vpop.eup %1759 }
 0x47e   : > { %v1762_v8 = vpop.eup %1761  ;;  %v1643_v9 = vpack.c.bf16 %v1760_v7, %v1756_v5 }
 0x47f   : > { %v1641_v10 = vpack.c.bf16 %v1762_v8, %v1758_v6  ;;  %v1133_v6 = vpop.permute.xlu1 %1132 }
 0x481   : > { %1642 = vmatprep.subr.bf16.mxu0 %v1641_v10 }
 0x482   : > { %1644 = vmatpush1.bf16.msra.mxu0 %v1643_v9 }
 0x485   : > { %1575 = vmatmul.mubr.msk.f32.vlgmr.msra.gmra.mrb[12].mxu0 %vm439_vm0, %v1567_v11 }
 0x486   : > { %1078 = vmatprep.mubr.f32.mxu0 %v1821_v23 }
 0x489   : > { %1576 = vmatmul.mubr.msk.f32.gmra.mrb[14].mxu0 %vm439_vm0, %v1568_v12 }
 0x48a   : > { %1084 = vmatprep.mubr.f32.mxu0 %v1821_v23 }
 0x48d   : > { %1577 = vmatmul.mubr.msk.f32.gmra.mrb[16].mxu0 %vm439_vm0, %v1569_v13 }
 0x48e   : > { %1090 = vmatprep.mubr.f32.mxu0 %v1821_v23 }
 0x491   : > { %1578 = vmatmul.mubr.msk.f32.gmra.mrb[18].mxu0 %vm439_vm0, %v1570_v14 }
 0x492   : > { %1350 = vmatprep.mubr.f32.mxu0 %v1821_v23 }
 0x558   : > { %v1074_v16 = vpop.f32.mrb[12].mxu0 }
 0x559   : > { %v1075_v17 = vadd.f32 %v1074_v16, %v979_v15  ;;  %v1076_v18 = vpop.f32.mrb[13].mxu0 }
 0x55a   : > { %v1077_v19 = vadd.f32 %v1076_v18, %v979_v15 }
 0x55b   : > { %1763 = vtanh.f32 %v1075_v17 }
 0x55c   : > { %v1080_v21 = vpop.f32.mrb[14].mxu0  ;;  %1765 = vtanh.f32 %v1077_v19 }
 0x55d   : > { %v1081_v22 = vadd.f32 %v1080_v21, %v984_v20  ;;  %v1082_v24 = vpop.f32.mrb[15].mxu0 }
 0x55e   : > { %v1083_v25 = vadd.f32 %v1082_v24, %v984_v20  ;;  %v1591_v24 = vld [vmem:[%s2164_s3 + $0xc0] sm:$0xff] }
 0x55f   : > { %1767 = vtanh.f32 %v1081_v22 }
 0x560   : > { %1769 = vtanh.f32 %v1083_v25  ;;  %v1086_v27 = vpop.f32.mrb[16].mxu0  ;;  %v1592_v25 = vld [vmem:[%s2164_s3 + $0xc8] sm:$0xff] }
 0x561   : > { %v1087_v28 = vadd.f32 %v1086_v27, %v989_v26  ;;  %v1088_v29 = vpop.f32.mrb[17].mxu0  ;;  %v1594_v27 = vld [vmem:[%s2164_s3 + $0xd8] sm:$0xff] }
 0x562   : > { %v1089_v30 = vadd.f32 %v1088_v29, %v989_v26  ;;  %v1593_v26 = vld [vmem:[%s2164_s3 + $0xd0] sm:$0xff] }
 0x563   : > { %1771 = vtanh.f32 %v1087_v28  ;;  %v1257_v28 = vpop.permute.xlu0 %1256 }
 0x564   : > { %v1092_v32 = vpop.f32.mrb[18].mxu0  ;;  %1773 = vtanh.f32 %v1089_v30 }
 0x565   : > { %v1093_v33 = vadd.f32 %v1092_v32, %v994_v31  ;;  %v1094_v34 = vpop.f32.mrb[19].mxu0  ;;  %v1764_v36 = vpop.eup %1763 }
 0x566   : > { %v1095_v35 = vadd.f32 %v1094_v34, %v994_v31  ;;  %v1766_v37 = vpop.eup %1765 }
 0x567   : > { %1775 = vtanh.f32 %v1093_v33  ;;  %v1262_v33 = vpop.permute.xlu1 %1261 }
 0x568   : > { %1777 = vtanh.f32 %v1095_v35 }
 0x569   : > { %v1768_v38 = vpop.eup %1767 }
 0x56a   : > { %v1770_v39 = vpop.eup %1769  ;;  %v1647_v40 = vpack.c.bf16 %v1768_v38, %v1764_v36 }
 0x56b   : > { %v1645_v41 = vpack.c.bf16 %v1770_v39, %v1766_v37 }
 0x56d   : > { %1646 = vmatprep.subr.bf16.mxu1 %v1645_v41  ;;  %v1772_v42 = vpop.eup %1771 }
 0x56e   : > { %1648 = vmatpush1.bf16.msra.mxu1 %v1647_v40  ;;  %v1774_v43 = vpop.eup %1773 }
 0x571   : > { %v1776_v44 = vpop.eup %1775 }
 0x572   : > { %v1778_v46 = vpop.eup %1777  ;;  %v1651_v47 = vpack.c.bf16 %v1776_v44, %v1772_v42  ;;  %v1272_v42 = vpop.permute.xlu1 %1271 }
 0x573   : > { %v1649_v49 = vpack.c.bf16 %v1778_v46, %v1774_v43 }
 0x575   : > { %1650 = vmatprep.subr.bf16.mxu1 %v1649_v49 }
 0x576   : > { %1652 = vmatpush1.bf16.msra.mxu1 %v1651_v47 }
 0x579   : > { %1587 = vmatmul.mubr.msk.f32.vlgmr.msra.gmra.mrb[20].mxu1 %vm439_vm0, %v1579_v50 }
 0x57a   : > { %1217 = vmatprep.mubr.f32.mxu1 %v1821_v23 }
 0x57d   : > { %1588 = vmatmul.mubr.msk.f32.gmra.mrb[22].mxu1 %vm439_vm0, %v1580_v51 }
 0x57e   : > { %1223 = vmatprep.mubr.f32.mxu1 %v1821_v23 }
 0x581   : > { %1589 = vmatmul.mubr.msk.f32.gmra.mrb[24].mxu1 %vm439_vm0, %v1581_v53 }
 0x582   : > { %1229 = vmatprep.mubr.f32.mxu1 %v1821_v23 }
 0x585   : > { %1590 = vmatmul.mubr.msk.f32.gmra.mrb[26].mxu1 %vm439_vm0, %v1582_v54  ;;  %v1395_v54 = vpop.permute.xlu1 %1394 }
 0x64c   : > { %v1213_v56 = vpop.f32.mrb[20].mxu1 }
 0x64d   : > { %v1214_v57 = vadd.f32 %v1213_v56, %v1118_v55  ;;  %v1215_v58 = vpop.f32.mrb[21].mxu1 }
 0x64e   : > { %v1216_v59 = vadd.f32 %v1215_v58, %v1118_v55 }
 0x64f   : > { %1779 = vtanh.f32 %v1214_v57 }
 0x650   : > { %v1219_v61 = vpop.f32.mrb[22].mxu1  ;;  %1781 = vtanh.f32 %v1216_v59 }
 0x651   : > { %v1220_v62 = vadd.f32 %v1219_v61, %v1123_v60  ;;  %v1221_v63 = vpop.f32.mrb[23].mxu1 }
 0x652   : > { %v1222_v0 = vadd.f32 %v1221_v63, %v1123_v60 }
 0x653   : > { %1783 = vtanh.f32 %v1220_v62 }
 0x654   : > { %1785 = vtanh.f32 %v1222_v0  ;;  %v1225_v2 = vpop.f32.mrb[24].mxu1 }
 0x655   : > { %v1226_v3 = vadd.f32 %v1225_v2, %v1128_v1  ;;  %v1227_v4 = vpop.f32.mrb[25].mxu1 }
 0x656   : > { %v1228_v5 = vadd.f32 %v1227_v4, %v1128_v1 }
 0x657   : > { %1787 = vtanh.f32 %v1226_v3 }
 0x658   : > { %v1231_v7 = vpop.f32.mrb[26].mxu1  ;;  %1789 = vtanh.f32 %v1228_v5  ;;  %v1405_v5 = vpop.permute.xlu1 %1404 }
 0x659   : > { %v1232_v8 = vadd.f32 %v1231_v7, %v1133_v6  ;;  %v1233_v9 = vpop.f32.mrb[27].mxu1  ;;  %v1780_v11 = vpop.eup %1779 }
 0x65a   : > { %v1234_v10 = vadd.f32 %v1233_v9, %v1133_v6  ;;  %v1782_v12 = vpop.eup %1781 }
 0x65b   : > { %1791 = vtanh.f32 %v1232_v8 }
 0x65c   : > { %1793 = vtanh.f32 %v1234_v10 }
 0x65d   : > { %v1784_v13 = vpop.eup %1783 }
 0x65e   : > { %v1786_v14 = vpop.eup %1785  ;;  %v1655_v15 = vpack.c.bf16 %v1784_v13, %v1780_v11 }
 0x65f   : > { %v1653_v16 = vpack.c.bf16 %v1786_v14, %v1782_v12 }
 0x661   : > { %1654 = vmatprep.subr.bf16.mxu0 %v1653_v16  ;;  %v1788_v17 = vpop.eup %1787 }
 0x662   : > { %1656 = vmatpush1.bf16.msra.mxu0 %v1655_v15  ;;  %v1790_v18 = vpop.eup %1789 }
 0x665   : > { %v1792_v19 = vpop.eup %1791 }
 0x666   : > { %v1794_v20 = vpop.eup %1793  ;;  %v1659_v21 = vpack.c.bf16 %v1792_v19, %v1788_v17  ;;  %v1822_v17 = vmov 1966171168  }
 0x667   : > { %v1657_v22 = vpack.c.bf16 %v1794_v20, %v1790_v18  ;;  %v1449_v18 = vunpack.c.l.s4 %v1822_v17 }
 0x669   : > { %1658 = vmatprep.subr.bf16.mxu0 %v1657_v22 }
 0x66a   : > { %1660 = vmatpush1.bf16.msra.mxu0 %v1659_v21 }
 0x66d   : > { %1599 = vmatmul.mubr.msk.f32.vlgmr.msra.gmra.mrb[20].mxu0 %vm439_vm0, %v1591_v24 }
 0x66e   : > { %1356 = vmatprep.mubr.f32.mxu0 %v1821_v23 }
 0x671   : > { %1600 = vmatmul.mubr.msk.f32.gmra.mrb[22].mxu0 %vm439_vm0, %v1592_v25  ;;  %v1450_v25 = vunpack.c.0.s8 %v1449_v18 }
 0x672   : > { %1362 = vmatprep.mubr.f32.mxu0 %v1821_v23 }
 0x675   : > { %1601 = vmatmul.mubr.msk.f32.gmra.mrb[24].mxu0 %vm439_vm0, %v1593_v26 }
 0x676   : > { %1368 = vmatprep.mubr.f32.mxu0 %v1821_v23  ;;  %v1267_v23 = vpop.permute.xlu0 %1266 }
 0x679   : > { %1602 = vmatmul.mubr.msk.f32.gmra.mrb[26].mxu0 %vm439_vm0, %v1594_v27 }
 0x67a   : > { %v1390_v50 = vpop.permute.xlu0 %1389 }
 0x67e   : > { %v1400_v62 = vpop.permute.xlu0 %1399 }
 0x682   : > { %v1437_v21 = vpop.permute.xlu0 %1436 }
 0x683   : > { %v1442_v27 = vrot.slane %v1437_v21, %v2008_v52 }
 0x740   : > { %v1352_v29 = vpop.f32.mrb[20].mxu0 }
 0x741   : > { %v1353_v30 = vadd.f32 %v1352_v29, %v1257_v28  ;;  %v1354_v31 = vpop.f32.mrb[21].mxu0 }
 0x742   : > { %v1355_v32 = vadd.f32 %v1354_v31, %v1257_v28  ;;  %v1453_v31 = vsub.s32 %v1450_v25, %v2002_v48 }
 0x743   : > { %1795 = vtanh.f32 %v1353_v30 }
 0x744   : > { %v1358_v34 = vpop.f32.mrb[22].mxu0  ;;  %1797 = vtanh.f32 %v1355_v32 }
 0x745   : > { %v1359_v35 = vadd.f32 %v1358_v34, %v1262_v33  ;;  %v1360_v36 = vpop.f32.mrb[23].mxu0 }
 0x746   : > { %v1361_v37 = vadd.f32 %v1360_v36, %v1262_v33 }
 0x747   : > { %1799 = vtanh.f32 %v1359_v35 }
 0x748   : > { %1801 = vtanh.f32 %v1361_v37  ;;  %v1364_v38 = vpop.f32.mrb[24].mxu0 }
 0x749   : > { %v1365_v39 = vadd.f32 %v1364_v38, %v1267_v23  ;;  %v1366_v40 = vpop.f32.mrb[25].mxu0 }
 0x74a   : > { %v1367_v41 = vadd.f32 %v1366_v40, %v1267_v23 }
 0x74b   : > { %1803 = vtanh.f32 %v1365_v39 }
 0x74c   : > { %1805 = vtanh.f32 %v1367_v41  ;;  %v1370_v43 = vpop.f32.mrb[26].mxu0 }
 0x74d   : > { %v1371_v44 = vadd.f32 %v1370_v43, %v1272_v42  ;;  %v1372_v46 = vpop.f32.mrb[27].mxu0  ;;  %v1796_v49 = vpop.eup %1795 }
 0x74e   : > { %v1373_v47 = vadd.f32 %v1372_v46, %v1272_v42  ;;  %v1798_v51 = vpop.eup %1797  ;;  %v1407_v56 = vmul.f32 %v1796_v49, %v1390_v50 }
 0x74f   : > { %1807 = vtanh.f32 %v1371_v44  ;;  %v1408_v58 = vmul.f32 %v1798_v51, %v1390_v50 }
 0x750   : > { %1809 = vtanh.f32 %v1373_v47 }
 0x751   : > { %v1800_v53 = vpop.eup %1799 }
 0x752   : > { %v1802_v55 = vpop.eup %1801  ;;  %v1409_v57 = vmul.f32 %v1800_v53, %v1395_v54 }
 0x753   : > { %v1410_v59 = vmul.f32 %v1802_v55, %v1395_v54 }
 0x754   : > { %v1415_v60 = vadd.f32 %v1409_v57, %v1407_v56 }
 0x755   : > { %v1804_v61 = vpop.eup %1803  ;;  %v1424_v63 = vadd.f32 %v1410_v59, %v1408_v58 }
 0x756   : > { %v1806_v0 = vpop.eup %1805  ;;  %v1411_v1 = vmul.f32 %v1804_v61, %v1400_v62 }
 0x757   : > { %v1412_v2 = vmul.f32 %v1806_v0, %v1400_v62 }
 0x758   : > { %v1416_v3 = vadd.f32 %v1415_v60, %v1411_v1 }
 0x759   : > { %v1808_v4 = vpop.eup %1807  ;;  %v1425_v6 = vadd.f32 %v1424_v63, %v1412_v2 }
 0x75a   : > { %v1810_v7 = vpop.eup %1809  ;;  %v1413_v8 = vmul.f32 %v1808_v4, %v1405_v5 }
 0x75b   : > { %v1414_v9 = vmul.f32 %v1810_v7, %v1405_v5 }
 0x75c   : > { %v1417_v10 = vadd.f32 %v1416_v3, %v1413_v8 }
 0x75d   : > { %v1426_v11 = vadd.f32 %v1425_v6, %v1414_v9 }
 0x75e   : > { %v1418_v12 = vrot.slane %v1417_v10, 4 }
 0x75f   : > { %v1427_v13 = vrot.slane %v1426_v11, 4 }
 0x760   : > { %v1419_v14 = vadd.f32 %v1418_v12, %v1417_v10 }
 0x761   : > { %v1428_v15 = vadd.f32 %v1427_v13, %v1426_v11 }
 0x762   : > { %v1420_v16 = vrot.slane %v1419_v14, 2 }
 0x763   : > { %v1429_v19 = vrot.slane %v1428_v15, 2 }
 0x764   : > { %v1421_v20 = vadd.f32 %v1420_v16, %v1419_v14 }
 0x765   : > { %v1430_v22 = vadd.f32 %v1429_v19, %v1428_v15 }
 0x766   : > { %v1422_v24 = vrot.slane %v1421_v20, 1 }
 0x767   : > { %v1431_v26 = vrot.slane %v1430_v22, 1 }
 0x768   : > { %v1423_v28 = vadd.f32 %v1422_v24, %v1421_v20 }
 0x769   : > { %v1432_v29 = vadd.f32 %v1431_v26, %v1430_v22 }
 0x76a   : > { %v1443_v30 = vadd.f32 %v1442_v27, %v1423_v28 }
 0x76b   : > { %v1444_v32 = vadd.f32 %v1442_v27, %v1432_v29 }
 0x76d   : > { %v1447_v33 = vcombine.low %v1443_v30, %v1444_v32 }
 0x76f   : > { %v1454_v34 = vrot.slane %v1447_v33, %v1453_v31 }
 0x771   : > { %v1461_v35 = vrot.slane %v1454_v34, %v1453_v31 }
 0x773   : > { %1467 = vst.msk [vmem:[%s280_s14] sm:$0x3] %vm1465_vm1, %v1461_v35 }
 0x774 PF: > { %s19_s26 = sadd.s32 1, %s1817_s26  }
 0x775   : > { %p16_p4 = scmp.ge.s32.totalorder %s19_s26, 5  }
 0x777   :  { %18 = sbr.rel (!%p16_p4) target bundleno = 3 (0x3), region = 91 }

</bundles_post_ra>
